<compile_context>
chip_gen: v7x
topology: tpu7x:2x2x1
jax: 0.10.0
libtpu: 0.0.40
codegen_flags: <defaults>
</compile_context>

<pallas_src>
import jax
import jax.numpy as jnp
from jax.experimental import pallas as pl
from jax.experimental.pallas import tpu as pltpu

EPS = 1e-5  # nn.BatchNorm1d default eps


def resblock_kernel(x_ref, w1_ref, bn1_ref, w2_ref, bn2_ref, o_ref, xb_ref):
    j = pl.program_id(0)
    nj = pl.num_programs(0)

    # Cast x to bf16 once; the bf16 copy stays resident for every hidden-dim tile.
    @pl.when(j == 0)
    def _cast_x():
        xb_ref[...] = x_ref[...].astype(jnp.bfloat16)

    xb = xb_ref[...]                                    # (B, Din) bf16, resident
    inv_b = 1.0 / xb.shape[0]

    # ---- fc1 column tile (bias dropped: cancelled exactly by BN1 mean subtraction) ----
    h = jnp.dot(xb, w1_ref[...], preferred_element_type=jnp.float32)   # (B, tk) fp32

    # ---- BN1: one-pass batch stats on row-0-shifted values (cancellation guard),
    #      XLU column sums, folded into a single per-tile scale/shift FMA. ----
    h0 = h[0:1, :]                                      # per-feature anchor row
    hc = h - h0
    m_c = jnp.sum(hc, axis=0, keepdims=True) * inv_b
    var1 = jnp.maximum(jnp.sum(hc * hc, axis=0, keepdims=True) * inv_b - m_c * m_c, 0.0)
    mean1 = m_c + h0
    bn1 = bn1_ref[...]                                  # (2, tk): [gamma; beta]
    scale1 = bn1[0:1, :] * jax.lax.rsqrt(var1 + EPS)
    shift1 = bn1[1:2, :] - mean1 * scale1
    a = jnp.maximum(h * scale1 + shift1, 0.0)           # BN1 + ReLU in one fused pass

    # ---- fc2 partial product, accumulated directly into the resident output block ----
    part = jnp.dot(a.astype(jnp.bfloat16), w2_ref[...],
                   preferred_element_type=jnp.float32)                  # (B, Dout) fp32

    @pl.when(j == 0)
    def _first():
        o_ref[...] = part                               # no zero-init + reload at step 0

    @pl.when(j > 0)
    def _accum():
        o_ref[...] += part

    # ---- finalize: BN2 (exact two-pass variance) + residual + ReLU, in place ----
    @pl.when(j == nj - 1)
    def _finalize():
        h2 = o_ref[...]                                 # (B, Dout) full fc2 output
        mean2 = jnp.sum(h2, axis=0, keepdims=True) * inv_b
        c = h2 - mean2
        var2 = jnp.sum(c * c, axis=0, keepdims=True) * inv_b
        bn2 = bn2_ref[...]                              # (2, Dout): [gamma; beta]
        scale2 = bn2[0:1, :] * jax.lax.rsqrt(var2 + EPS)
        # downsample=None -> residual = x; final ReLU.
        o_ref[...] = jnp.maximum(c * scale2 + bn2[1:2, :] + x_ref[...], 0.0)


def resblock_forward(x, w1, gamma1, beta1, w2, gamma2, beta2, *, tk=256):
    """x: (B, Din) fp32.  w1: (Din, K), w2: (K, Dout), stored (in, out) = torch W.T.
    Linear biases are omitted on purpose: training-mode BN cancels them exactly."""
    B, Din = x.shape
    K = w1.shape[1]
    Dout = w2.shape[1]
    assert w2.shape[0] == K and Din == Dout, "residual add needs input_units == output_units"

    # Lane-dense hidden tile: a multiple of 128, capped at the 128-rounded hidden dim.
    k128 = -(-K // 128) * 128
    tk = max(128, min((int(tk) // 128) * 128, k128))
    Kp = -(-k128 // tk) * tk                  # pad hidden dim so the grid divides exactly
    nk = Kp // tk
    if Kp > K:
        # Padded hidden units are inert: zero W1 columns -> h = 0; gamma = beta = 0 ->
        # a = relu(0) = 0; zero W2 rows -> zero contribution to fc2.
        pad = Kp - K
        w1 = jnp.pad(w1, ((0, 0), (0, pad)))
        w2 = jnp.pad(w2, ((0, pad), (0, 0)))
        gamma1 = jnp.pad(gamma1, (0, pad))
        beta1 = jnp.pad(beta1, (0, pad))

    # bf16 weights for the MXU (fp32 accumulation in-kernel); BN params packed per layer.
    w1b = w1.astype(jnp.bfloat16)
    w2b = w2.astype(jnp.bfloat16)
    bn1p = jnp.stack([gamma1, beta1], axis=0).astype(jnp.float32)       # (2, Kp)
    bn2p = jnp.stack([gamma2, beta2], axis=0).astype(jnp.float32)       # (2, Dout)

    # Deeper weight-streaming pipeline only when there are enough steps to hide DMA.
    nbuf = 3 if nk >= 3 else 2
    wkw = {"pipeline_mode": pl.Buffered(nbuf)} if nbuf > 2 else {}

    grid_spec = pltpu.PrefetchScalarGridSpec(
        num_scalar_prefetch=0,
        grid=(nk,),
        in_specs=[
            pl.BlockSpec((B, Din), lambda j: (0, 0)),                   # x: resident
            pl.BlockSpec((Din, tk), lambda j: (0, j), **wkw),           # W1 column tile
            pl.BlockSpec((2, tk), lambda j: (0, j)),                    # BN1 gamma/beta tile
            pl.BlockSpec((tk, Dout), lambda j: (j, 0), **wkw),          # W2 row tile
            pl.BlockSpec((2, Dout), lambda j: (0, 0)),                  # BN2 gamma/beta
        ],
        out_specs=pl.BlockSpec((B, Dout), lambda j: (0, 0)),            # resident accumulator
        scratch_shapes=[pltpu.VMEM((B, Din), jnp.bfloat16)],            # one-time bf16(x)
    )

    # VMEM budget: residents + multi-buffered streamed tiles, 25% headroom, clamped to
    # stay comfortably inside v7x's 64 MiB physical VMEM (v5e/v6e have 128 MiB).
    resident = B * Din * 4 + B * Din * 2 + B * Dout * 4 + 2 * Dout * 4
    streamed = nbuf * (Din * tk * 2 + tk * Dout * 2 + 2 * tk * 4)
    vmem_limit = int(min(56 << 20, max(32 << 20, (resident + streamed) * 5 // 4)))

    return pl.pallas_call(
        resblock_kernel,
        out_shape=jax.ShapeDtypeStruct((B, Dout), jnp.float32),
        grid_spec=grid_spec,
        compiler_params=pltpu.CompilerParams(
            dimension_semantics=("arbitrary",),         # hidden-dim accumulation axis
            vmem_limit_bytes=vmem_limit,
        ),
    )(x, w1b, bn1p, w2b, bn2p)


def init_params(key, input_units, output_units):
    """PyTorch-style init. Weights stored (in, out) == torch_weight.T.
    BN gamma/beta are randomized (as after training) to exercise the affine fold."""
    ks = jax.random.split(key, 8)
    bound1 = 1.0 / (input_units ** 0.5)
    bound2 = 1.0 / (output_units ** 0.5)
    w1 = jax.random.uniform(ks[0], (input_units, output_units), jnp.float32, -bound1, bound1)
    b1 = jax.random.uniform(ks[1], (output_units,), jnp.float32, -bound1, bound1)
    w2 = jax.random.uniform(ks[2], (output_units, output_units), jnp.float32, -bound2, bound2)
    b2 = jax.random.uniform(ks[3], (output_units,), jnp.float32, -bound2, bound2)
    g1 = jax.random.uniform(ks[4], (output_units,), jnp.float32, 0.5, 1.5)
    be1 = jax.random.uniform(ks[5], (output_units,), jnp.float32, -0.1, 0.1)
    g2 = jax.random.uniform(ks[6], (output_units,), jnp.float32, 0.5, 1.5)
    be2 = jax.random.uniform(ks[7], (output_units,), jnp.float32, -0.1, 0.1)
    return dict(w1=w1, b1=b1, g1=g1, be1=be1, w2=w2, b2=b2, g2=g2, be2=be2)


def reference_forward(x, w1, b1, g1, be1, w2, b2, g2, be2):
    """Pure-JAX fp32 reference of the PyTorch module (training-mode BN, with biases)."""
    h = x @ w1 + b1
    m = jnp.mean(h, axis=0)
    v = jnp.mean((h - m) ** 2, axis=0)                  # biased batch variance
    h = jnp.maximum(g1 * (h - m) / jnp.sqrt(v + EPS) + be1, 0.0)
    h2 = h @ w2 + b2
    m2 = jnp.mean(h2, axis=0)
    v2 = jnp.mean((h2 - m2) ** 2, axis=0)
    h2 = g2 * (h2 - m2) / jnp.sqrt(v2 + EPS) + be2
    return jnp.maximum(h2 + x, 0.0)


if __name__ == "__main__":
    # downsample=None -> residual add requires input_units == output_units.
    # D = 320 is deliberately NOT a multiple of the 256-wide tile: the hidden dim is
    # zero-padded to 512 and the grid runs 2 accumulation steps, exercising both the
    # padding path and the resident-output accumulation.
    B, D = 8, 320
    key = jax.random.PRNGKey(0)
    kx, kp = jax.random.split(key)
    x = jax.random.normal(kx, (B, D), jnp.float32)
    p = init_params(kp, D, D)

    out = resblock_forward(x, p["w1"], p["g1"], p["be1"], p["w2"], p["g2"], p["be2"], tk=256)
    out = jax.block_until_ready(out)
    ref = reference_forward(x, p["w1"], p["b1"], p["g1"], p["be1"],
                            p["w2"], p["b2"], p["g2"], p["be2"])
    assert out.shape == ref.shape == (B, D)
    err = float(jnp.max(jnp.abs(out - ref)))
    # bf16 matmul inputs vs the fp32 reference -> loosened tolerance.
    assert jnp.allclose(out, ref, atol=5e-2, rtol=5e-2), f"mismatch vs reference (max abs err {err})"

    # Poorly-centered input: stresses the one-pass BN1 statistics (|mean| >> std).
    # Scale-aware check: a batch-stat cancellation regression would blow up by O(1).
    x2 = x + 4.0
    out2 = jax.block_until_ready(
        resblock_forward(x2, p["w1"], p["g1"], p["be1"], p["w2"], p["g2"], p["be2"], tk=256))
    ref2 = reference_forward(x2, p["w1"], p["b1"], p["g1"], p["be1"],
                             p["w2"], p["b2"], p["g2"], p["be2"])
    assert bool(jnp.all(jnp.isfinite(out2)))
    err2 = float(jnp.max(jnp.abs(out2 - ref2)))
    assert err2 <= 5e-2 * (1.0 + float(jnp.max(jnp.abs(ref2)))), \
        f"offset-input mismatch vs reference (max abs err {err2})"

    print("KERNEL_OK")
</pallas_src>

<mosaic_0001>
module attributes {stable_mosaic.version = 11 : i64} {
  func.func @resblock_kernel(%arg0: i32, %arg1: memref<8x320xf32, #tpu.memory_space<vmem>>, %arg2: memref<320x256xbf16, #tpu.memory_space<vmem>>, %arg3: memref<2x256xf32, #tpu.memory_space<vmem>>, %arg4: memref<256x320xbf16, #tpu.memory_space<vmem>>, %arg5: memref<2x320xf32, #tpu.memory_space<vmem>>, %arg6: memref<8x320xf32, #tpu.memory_space<vmem>>, %arg7: memref<8x320xbf16, #tpu.memory_space<vmem>>) attributes {dimension_semantics = [#tpu.dimension_semantics<arbitrary>], iteration_bounds = array<i64: 2>, scalar_prefetch = 0 : i64, scratch_operands = 1 : i64, tpu.core_type = #tpu.core_type<tc>, window_params = [{pipeline_mode = #tpu.pipeline_mode<synchronous>, transform_indices = @transform_0, window_bounds = array<i64: 8, 320>}, {transform_indices = @transform_1, window_bounds = array<i64: 320, 256>}, {transform_indices = @transform_2, window_bounds = array<i64: 2, 256>}, {transform_indices = @transform_3, window_bounds = array<i64: 256, 320>}, {pipeline_mode = #tpu.pipeline_mode<synchronous>, transform_indices = @transform_4, window_bounds = array<i64: 2, 320>}, {pipeline_mode = #tpu.pipeline_mode<synchronous>, transform_indices = @transform_5, window_bounds = array<i64: 8, 320>}]} {
    %c0_i32 = arith.constant 0 : i32
    %0 = arith.cmpi eq, %arg0, %c0_i32 : i32
    %1 = arith.extui %0 : i1 to i32
    %c0_i32_0 = arith.constant 0 : i32
    %2 = arith.cmpi ne, %1, %c0_i32_0 : i32
    scf.if %2 {
      %c0_21 = arith.constant 0 : index
      %c0_22 = arith.constant 0 : index
      %50 = vector.load %arg1[%c0_21, %c0_22] : memref<8x320xf32, #tpu.memory_space<vmem>>, vector<8x320xf32>
      %51 = arith.truncf %50 : vector<8x320xf32> to vector<8x320xbf16>
      %c0_23 = arith.constant 0 : index
      %c0_24 = arith.constant 0 : index
      %52 = vector.load %arg7[%c0_23, %c0_24] : memref<8x320xbf16, #tpu.memory_space<vmem>>, vector<8x320xbf16>
      tpu.vector_store %arg7[%c0_23, %c0_24], %51 {strides = array<i32>} : memref<8x320xbf16, #tpu.memory_space<vmem>>, vector<8x320xbf16>,
    } else {
    }
    %c0 = arith.constant 0 : index
    %c0_1 = arith.constant 0 : index
    %3 = vector.load %arg7[%c0, %c0_1] : memref<8x320xbf16, #tpu.memory_space<vmem>>, vector<8x320xbf16>
    %c0_2 = arith.constant 0 : index
    %c0_3 = arith.constant 0 : index
    %4 = vector.load %arg2[%c0_2, %c0_3] : memref<320x256xbf16, #tpu.memory_space<vmem>>, vector<320x256xbf16>
    %cst = arith.constant dense<0.000000e+00> : vector<8x256xf32>
    %5 = tpu.matmul %3, %4, %cst {dimension_numbers = #tpu.dot_dimension_numbers<[1], [0], [0], [1], [0, 0, 1, 1], [], []>} : vector<8x320xbf16>, vector<320x256xbf16>, vector<8x256xf32> -> vector<8x256xf32>
    %6 = vector.extract_strided_slice %5 {offsets = [0, 0], sizes = [1, 256], strides = [1, 1]} : vector<8x256xf32> to vector<1x256xf32>
    %7 = vector.broadcast %6 : vector<1x256xf32> to vector<8x256xf32>
    %8 = arith.subf %5, %7 : vector<8x256xf32>
    %cst_4 = arith.constant dense<0.000000e+00> : vector<256xf32>
    %9 = vector.multi_reduction <add>, %8, %cst_4 [0] : vector<8x256xf32> to vector<256xf32>
    %10 = vector.shape_cast %9 : vector<256xf32> to vector<1x256xf32>
    %cst_5 = arith.constant 1.250000e-01 : f32
    %11 = vector.broadcast %cst_5 : f32 to vector<1x256xf32>
    %12 = arith.mulf %10, %11 : vector<1x256xf32>
    %13 = arith.mulf %8, %8 : vector<8x256xf32>
    %cst_6 = arith.constant dense<0.000000e+00> : vector<256xf32>
    %14 = vector.multi_reduction <add>, %13, %cst_6 [0] : vector<8x256xf32> to vector<256xf32>
    %15 = vector.shape_cast %14 : vector<256xf32> to vector<1x256xf32>
    %cst_7 = arith.constant 1.250000e-01 : f32
    %16 = vector.broadcast %cst_7 : f32 to vector<1x256xf32>
    %17 = arith.mulf %15, %16 : vector<1x256xf32>
    %18 = arith.mulf %12, %12 : vector<1x256xf32>
    %19 = arith.subf %17, %18 : vector<1x256xf32>
    %cst_8 = arith.constant 0.000000e+00 : f32
    %20 = vector.broadcast %cst_8 : f32 to vector<1x256xf32>
    %21 = arith.maximumf %19, %20 : vector<1x256xf32>
    %22 = arith.addf %12, %6 : vector<1x256xf32>
    %c0_9 = arith.constant 0 : index
    %c0_10 = arith.constant 0 : index
    %23 = vector.load %arg3[%c0_9, %c0_10] : memref<2x256xf32, #tpu.memory_space<vmem>>, vector<2x256xf32>
    %24 = vector.extract_strided_slice %23 {offsets = [0, 0], sizes = [1, 256], strides = [1, 1]} : vector<2x256xf32> to vector<1x256xf32>
    %cst_11 = arith.constant 9.99999974E-6 : f32
    %25 = vector.broadcast %cst_11 : f32 to vector<1x256xf32>
    %26 = arith.addf %21, %25 : vector<1x256xf32>
    %27 = math.rsqrt %26 : vector<1x256xf32>
    %28 = arith.mulf %24, %27 : vector<1x256xf32>
    %29 = vector.extract_strided_slice %23 {offsets = [1, 0], sizes = [1, 256], strides = [1, 1]} : vector<2x256xf32> to vector<1x256xf32>
    %30 = arith.mulf %22, %28 : vector<1x256xf32>
    %31 = arith.subf %29, %30 : vector<1x256xf32>
    %32 = vector.broadcast %28 : vector<1x256xf32> to vector<8x256xf32>
    %33 = arith.mulf %5, %32 : vector<8x256xf32>
    %34 = vector.broadcast %31 : vector<1x256xf32> to vector<8x256xf32>
    %35 = arith.addf %33, %34 : vector<8x256xf32>
    %cst_12 = arith.constant 0.000000e+00 : f32
    %36 = vector.broadcast %cst_12 : f32 to vector<8x256xf32>
    %37 = arith.maximumf %35, %36 : vector<8x256xf32>
    %38 = arith.truncf %37 : vector<8x256xf32> to vector<8x256xbf16>
    %c0_13 = arith.constant 0 : index
    %c0_14 = arith.constant 0 : index
    %39 = vector.load %arg4[%c0_13, %c0_14] : memref<256x320xbf16, #tpu.memory_space<vmem>>, vector<256x320xbf16>
    %cst_15 = arith.constant dense<0.000000e+00> : vector<8x320xf32>
    %40 = tpu.matmul %38, %39, %cst_15 {dimension_numbers = #tpu.dot_dimension_numbers<[1], [0], [0], [1], [0, 0, 1, 1], [], []>} : vector<8x256xbf16>, vector<256x320xbf16>, vector<8x320xf32> -> vector<8x320xf32>
    %c0_i32_16 = arith.constant 0 : i32
    %41 = arith.cmpi eq, %arg0, %c0_i32_16 : i32
    %42 = arith.extui %41 : i1 to i32
    %c0_i32_17 = arith.constant 0 : i32
    %43 = arith.cmpi ne, %42, %c0_i32_17 : i32
    scf.if %43 {
      %c0_21 = arith.constant 0 : index
      %c0_22 = arith.constant 0 : index
      %50 = vector.load %arg6[%c0_21, %c0_22] : memref<8x320xf32, #tpu.memory_space<vmem>>, vector<8x320xf32>
      tpu.vector_store %arg6[%c0_21, %c0_22], %40 {strides = array<i32>} : memref<8x320xf32, #tpu.memory_space<vmem>>, vector<8x320xf32>,
    } else {
    }
    %c0_i32_18 = arith.constant 0 : i32
    %44 = arith.cmpi sgt, %arg0, %c0_i32_18 : i32
    %45 = arith.extui %44 : i1 to i32
    %c0_i32_19 = arith.constant 0 : i32
    %46 = arith.cmpi ne, %45, %c0_i32_19 : i32
    scf.if %46 {
      %c0_21 = arith.constant 0 : index
      %c0_22 = arith.constant 0 : index
      %50 = vector.load %arg6[%c0_21, %c0_22] : memref<8x320xf32, #tpu.memory_space<vmem>>, vector<8x320xf32>
      %51 = arith.addf %50, %40 : vector<8x320xf32>
      %c0_23 = arith.constant 0 : index
      %c0_24 = arith.constant 0 : index
      %52 = vector.load %arg6[%c0_23, %c0_24] : memref<8x320xf32, #tpu.memory_space<vmem>>, vector<8x320xf32>
      tpu.vector_store %arg6[%c0_23, %c0_24], %51 {strides = array<i32>} : memref<8x320xf32, #tpu.memory_space<vmem>>, vector<8x320xf32>,
    } else {
    }
    %c1_i32 = arith.constant 1 : i32
    %47 = arith.cmpi eq, %arg0, %c1_i32 : i32
    %48 = arith.extui %47 : i1 to i32
    %c0_i32_20 = arith.constant 0 : i32
    %49 = arith.cmpi ne, %48, %c0_i32_20 : i32
    scf.if %49 {
      %c0_21 = arith.constant 0 : index
      %c0_22 = arith.constant 0 : index
      %50 = vector.load %arg6[%c0_21, %c0_22] : memref<8x320xf32, #tpu.memory_space<vmem>>, vector<8x320xf32>
      %cst_23 = arith.constant dense<0.000000e+00> : vector<320xf32>
      %51 = vector.multi_reduction <add>, %50, %cst_23 [0] : vector<8x320xf32> to vector<320xf32>
      %52 = vector.shape_cast %51 : vector<320xf32> to vector<1x320xf32>
      %cst_24 = arith.constant 1.250000e-01 : f32
      %53 = vector.broadcast %cst_24 : f32 to vector<1x320xf32>
      %54 = arith.mulf %52, %53 : vector<1x320xf32>
      %55 = vector.broadcast %54 : vector<1x320xf32> to vector<8x320xf32>
      %56 = arith.subf %50, %55 : vector<8x320xf32>
      %57 = arith.mulf %56, %56 : vector<8x320xf32>
      %cst_25 = arith.constant dense<0.000000e+00> : vector<320xf32>
      %58 = vector.multi_reduction <add>, %57, %cst_25 [0] : vector<8x320xf32> to vector<320xf32>
      %59 = vector.shape_cast %58 : vector<320xf32> to vector<1x320xf32>
      %cst_26 = arith.constant 1.250000e-01 : f32
      %60 = vector.broadcast %cst_26 : f32 to vector<1x320xf32>
      %61 = arith.mulf %59, %60 : vector<1x320xf32>
      %c0_27 = arith.constant 0 : index
      %c0_28 = arith.constant 0 : index
      %62 = vector.load %arg5[%c0_27, %c0_28] : memref<2x320xf32, #tpu.memory_space<vmem>>, vector<2x320xf32>
      %63 = vector.extract_strided_slice %62 {offsets = [0, 0], sizes = [1, 320], strides = [1, 1]} : vector<2x320xf32> to vector<1x320xf32>
      %cst_29 = arith.constant 9.99999974E-6 : f32
      %64 = vector.broadcast %cst_29 : f32 to vector<1x320xf32>
      %65 = arith.addf %61, %64 : vector<1x320xf32>
      %66 = math.rsqrt %65 : vector<1x320xf32>
      %67 = arith.mulf %63, %66 : vector<1x320xf32>
      %68 = vector.broadcast %67 : vector<1x320xf32> to vector<8x320xf32>
      %69 = arith.mulf %56, %68 : vector<8x320xf32>
      %70 = vector.extract_strided_slice %62 {offsets = [1, 0], sizes = [1, 320], strides = [1, 1]} : vector<2x320xf32> to vector<1x320xf32>
      %71 = vector.broadcast %70 : vector<1x320xf32> to vector<8x320xf32>
      %72 = arith.addf %69, %71 : vector<8x320xf32>
      %c0_30 = arith.constant 0 : index
      %c0_31 = arith.constant 0 : index
      %73 = vector.load %arg1[%c0_30, %c0_31] : memref<8x320xf32, #tpu.memory_space<vmem>>, vector<8x320xf32>
      %74 = arith.addf %72, %73 : vector<8x320xf32>
      %cst_32 = arith.constant 0.000000e+00 : f32
      %75 = vector.broadcast %cst_32 : f32 to vector<8x320xf32>
      %76 = arith.maximumf %74, %75 : vector<8x320xf32>
      %c0_33 = arith.constant 0 : index
      %c0_34 = arith.constant 0 : index
      %77 = vector.load %arg6[%c0_33, %c0_34] : memref<8x320xf32, #tpu.memory_space<vmem>>, vector<8x320xf32>
      tpu.vector_store %arg6[%c0_33, %c0_34], %76 {strides = array<i32>} : memref<8x320xf32, #tpu.memory_space<vmem>>, vector<8x320xf32>,
    } else {
    }
    return
  }
  func.func @transform_0(%arg0: i32) -> (i32, i32) {
    %c0_i32 = arith.constant 0 : i32
    %c0_i32_0 = arith.constant 0 : i32
    %c0_i32_1 = arith.constant 0 : i32
    return %c0_i32, %c0_i32_0 : i32, i32
  }
  func.func @transform_1(%arg0: i32) -> (i32, i32) {
    %c0_i32 = arith.constant 0 : i32
    %c0_i32_0 = arith.constant 0 : i32
    return %c0_i32, %arg0 : i32, i32
  }
  func.func @transform_2(%arg0: i32) -> (i32, i32) {
    %c0_i32 = arith.constant 0 : i32
    %c0_i32_0 = arith.constant 0 : i32
    return %c0_i32, %arg0 : i32, i32
  }
  func.func @transform_3(%arg0: i32) -> (i32, i32) {
    %c0_i32 = arith.constant 0 : i32
    %c0_i32_0 = arith.constant 0 : i32
    return %arg0, %c0_i32 : i32, i32
  }
  func.func @transform_4(%arg0: i32) -> (i32, i32) {
    %c0_i32 = arith.constant 0 : i32
    %c0_i32_0 = arith.constant 0 : i32
    %c0_i32_1 = arith.constant 0 : i32
    return %c0_i32, %c0_i32_0 : i32, i32
  }
  func.func @transform_5(%arg0: i32) -> (i32, i32) {
    %c0_i32 = arith.constant 0 : i32
    %c0_i32_0 = arith.constant 0 : i32
    %c0_i32_1 = arith.constant 0 : i32
    return %c0_i32, %c0_i32_0 : i32, i32
  }
}

</mosaic_0001>

<bundles_post_ra>
// kernel: tpu_custom_call.1
= control target key start
LH: loop header
LB: loop body
LE: loop exit
PB: predicated region body
PF: predicated region fallthrough
CT: control target
= control target key end

     0   :  { %10 = vsyncpa [#allocation5], 0  ;;  %s1994_s18 = smov 0   ;;  %s1996_s19 = smov 0   ;;  %s2342_s0 = inlined_call_operand.vmem [shape: f32[8,320], index: 0, kind: input, shape index: {}]   ;;  %s2343_s1 = inlined_call_operand.vmem [shape: bf16[320,512], index: 1, kind: input, shape index: {}]   ;;  %s2344_s2 = inlined_call_operand.vmem [shape: f32[2,512], index: 2, kind: input, shape index: {}]   ;;  %s2345_s3 = inlined_call_operand.vmem [shape: bf16[512,320], index: 3, kind: input, shape index: {}]   ;;  %s2346_s4 = inlined_call_operand.vmem [shape: f32[2,320], index: 4, kind: input, shape index: {}]   ;;  %s2347_s5 = inlined_call_operand.hbm [shape: f32[8,320], index: 5, kind: output, shape index: {}]  }
   0x1   :  { %s1998_s20 = smov 0  }
   0x2 LB: > { %s2010_s21 = sadd.s32 4294967295, %s1959_s20   ;;  %s2013_s22 = sadd.s32 1, %s1959_s20   ;;  %s1959_s20 = sphi %s1998_s20, %s2350_s20   ;;  %s1955_s19 = sphi %s1996_s19, %s2349_s19   ;;  %s1951_s18 = sphi %s1994_s18, %s2348_s18  }
   0x3   : > { %s41_s23 = ssub.s32 %s1959_s20, %s2013_s22  ;;  %s44_s24 = sadd.s32 1, %s1955_s19 }
   0x4   : > { %p42_p0 = scmp.eq.s32.totalorder %s41_s23, 0  ;;  %p51_p1 = scmp.ne.s32.totalorder %s1955_s19, %s1951_s18 }
   0x5   : > { %p52_p2 = scmp.eq.s32.totalorder %s1959_s20, 0  ;;  %p1595_p4 = scmp.ge.s32.totalorder %s1959_s20, 2 }
   0x6   : > { %s2022_s25 = scalar_select %p42_p0, %s1955_s19, %s44_s24  }
   0x7   : > { %p53_p3 = por %p52_p2, %p51_p1  ;;  %177 = sbr.rel (%p1595_p4) target bundleno = 38 (0x26), region = 24 }
   0xe   : > { %180 = sbr.rel (!%p53_p3) target bundleno = 38 (0x26), region = 28  ;;  %s182_s26 = sand.u32 (%p53_p3), 1, %s1955_s19  }
   0xf   : > { %s1705_s27 = sshll.u32 (%p53_p3), %s1959_s20, 3  ;;  %s1734_s28 = smul.u32 (%p53_p3), 320, %s182_s26 }
  0x10   : > { %s2030_s6 = scalar_lea.vmem (%p53_p3), %s2343_s1, %s1705_s27 }
  0x11   : > { %v293_v0 = vld [vmem:[%s2030_s6] sm:$0xff] (%p53_p3)  ;;  %v295_v1 = vld [vmem:[%s2030_s6 + $0x10] sm:$0xff] (%p53_p3)  ;;  %s2038_s7 = scalar_lea.vmem (%p53_p3), [#allocation3], %s1734_s28 }
  0x12   : > { %v297_v2 = vld [vmem:[%s2030_s6 + $0x20] sm:$0xff] (%p53_p3)  ;;  %v299_v3 = vld [vmem:[%s2030_s6 + $0x30] sm:$0xff] (%p53_p3)  ;;  %294 = vst [vmem:[%s2038_s7] sm:$0xff] (%p53_p3), %v293_v0  ;;  %296 = vst [vmem:[%s2038_s7 + $0x8] sm:$0xff] (%p53_p3), %v295_v1 }
  0x13   : > { %v301_v4 = vld [vmem:[%s2030_s6 + $0x40] sm:$0xff] (%p53_p3)  ;;  %v303_v5 = vld [vmem:[%s2030_s6 + $0x50] sm:$0xff] (%p53_p3)  ;;  %298 = vst [vmem:[%s2038_s7 + $0x10] sm:$0xff] (%p53_p3), %v297_v2  ;;  %300 = vst [vmem:[%s2038_s7 + $0x18] sm:$0xff] (%p53_p3), %v299_v3 }
  0x14   : > { %302 = vst [vmem:[%s2038_s7 + $0x20] sm:$0xff] (%p53_p3), %v301_v4  ;;  %304 = vst [vmem:[%s2038_s7 + $0x28] sm:$0xff] (%p53_p3), %v303_v5  ;;  %v305_v6 = vld [vmem:[%s2030_s6 + $0x60] sm:$0xff] (%p53_p3)  ;;  %v307_v7 = vld [vmem:[%s2030_s6 + $0x70] sm:$0xff] (%p53_p3) }
  0x15   : > { %v309_v8 = vld [vmem:[%s2030_s6 + $0x80] sm:$0xff]  ;;  %306 = vst [vmem:[%s2038_s7 + $0x30] sm:$0xff] %v305_v6  ;;  %308 = vst [vmem:[%s2038_s7 + $0x38] sm:$0xff] %v307_v7  ;;  %v311_v9 = vld [vmem:[%s2030_s6 + $0x90] sm:$0xff] }
  0x16   : > { %310 = vst [vmem:[%s2038_s7 + $0x40] sm:$0xff] %v309_v8  ;;  %v313_v10 = vld [vmem:[%s2030_s6 + $0xa0] sm:$0xff]  ;;  %v315_v11 = vld [vmem:[%s2030_s6 + $0xb0] sm:$0xff]  ;;  %312 = vst [vmem:[%s2038_s7 + $0x48] sm:$0xff] %v311_v9 }
  0x17   : > { %314 = vst [vmem:[%s2038_s7 + $0x50] sm:$0xff] %v313_v10  ;;  %316 = vst [vmem:[%s2038_s7 + $0x58] sm:$0xff] %v315_v11  ;;  %v317_v12 = vld [vmem:[%s2030_s6 + $0xc0] sm:$0xff]  ;;  %v319_v13 = vld [vmem:[%s2030_s6 + $0xd0] sm:$0xff] }
  0x18   : > { %v321_v14 = vld [vmem:[%s2030_s6 + $0xe0] sm:$0xff]  ;;  %318 = vst [vmem:[%s2038_s7 + $0x60] sm:$0xff] %v317_v12  ;;  %320 = vst [vmem:[%s2038_s7 + $0x68] sm:$0xff] %v319_v13  ;;  %v323_v15 = vld [vmem:[%s2030_s6 + $0xf0] sm:$0xff] }
  0x19   : > { %322 = vst [vmem:[%s2038_s7 + $0x70] sm:$0xff] %v321_v14  ;;  %v325_v16 = vld [vmem:[%s2030_s6 + $0x100] sm:$0xff]  ;;  %v327_v17 = vld [vmem:[%s2030_s6 + $0x110] sm:$0xff]  ;;  %324 = vst [vmem:[%s2038_s7 + $0x78] sm:$0xff] %v323_v15 }
  0x1a   : > { %326 = vst [vmem:[%s2038_s7 + $0x80] sm:$0xff] %v325_v16  ;;  %328 = vst [vmem:[%s2038_s7 + $0x88] sm:$0xff] %v327_v17  ;;  %v329_v18 = vld [vmem:[%s2030_s6 + $0x120] sm:$0xff]  ;;  %v331_v19 = vld [vmem:[%s2030_s6 + $0x130] sm:$0xff] }
  0x1b   : > { %v333_v20 = vld [vmem:[%s2030_s6 + $0x140] sm:$0xff]  ;;  %330 = vst [vmem:[%s2038_s7 + $0x90] sm:$0xff] %v329_v18  ;;  %332 = vst [vmem:[%s2038_s7 + $0x98] sm:$0xff] %v331_v19  ;;  %v335_v21 = vld [vmem:[%s2030_s6 + $0x150] sm:$0xff] }
  0x1c   : > { %334 = vst [vmem:[%s2038_s7 + $0xa0] sm:$0xff] %v333_v20  ;;  %v337_v22 = vld [vmem:[%s2030_s6 + $0x160] sm:$0xff]  ;;  %v339_v23 = vld [vmem:[%s2030_s6 + $0x170] sm:$0xff]  ;;  %336 = vst [vmem:[%s2038_s7 + $0xa8] sm:$0xff] %v335_v21 }
  0x1d   : > { %338 = vst [vmem:[%s2038_s7 + $0xb0] sm:$0xff] %v337_v22  ;;  %340 = vst [vmem:[%s2038_s7 + $0xb8] sm:$0xff] %v339_v23  ;;  %v341_v24 = vld [vmem:[%s2030_s6 + $0x180] sm:$0xff]  ;;  %v343_v25 = vld [vmem:[%s2030_s6 + $0x190] sm:$0xff] }
  0x1e   : > { %v345_v26 = vld [vmem:[%s2030_s6 + $0x1a0] sm:$0xff]  ;;  %342 = vst [vmem:[%s2038_s7 + $0xc0] sm:$0xff] %v341_v24  ;;  %344 = vst [vmem:[%s2038_s7 + $0xc8] sm:$0xff] %v343_v25  ;;  %v347_v27 = vld [vmem:[%s2030_s6 + $0x1b0] sm:$0xff] }
  0x1f   : > { %346 = vst [vmem:[%s2038_s7 + $0xd0] sm:$0xff] %v345_v26  ;;  %v349_v28 = vld [vmem:[%s2030_s6 + $0x1c0] sm:$0xff]  ;;  %v351_v29 = vld [vmem:[%s2030_s6 + $0x1d0] sm:$0xff]  ;;  %348 = vst [vmem:[%s2038_s7 + $0xd8] sm:$0xff] %v347_v27 }
  0x20   : > { %350 = vst [vmem:[%s2038_s7 + $0xe0] sm:$0xff] %v349_v28  ;;  %352 = vst [vmem:[%s2038_s7 + $0xe8] sm:$0xff] %v351_v29  ;;  %v353_v30 = vld [vmem:[%s2030_s6 + $0x1e0] sm:$0xff]  ;;  %v355_v31 = vld [vmem:[%s2030_s6 + $0x1f0] sm:$0xff] }
  0x21   : > { %v357_v32 = vld [vmem:[%s2030_s6 + $0x200] sm:$0xff]  ;;  %354 = vst [vmem:[%s2038_s7 + $0xf0] sm:$0xff] %v353_v30  ;;  %356 = vst [vmem:[%s2038_s7 + $0xf8] sm:$0xff] %v355_v31  ;;  %v359_v33 = vld [vmem:[%s2030_s6 + $0x210] sm:$0xff] }
  0x22   : > { %358 = vst [vmem:[%s2038_s7 + $0x100] sm:$0xff] %v357_v32  ;;  %v361_v34 = vld [vmem:[%s2030_s6 + $0x220] sm:$0xff]  ;;  %v363_v35 = vld [vmem:[%s2030_s6 + $0x230] sm:$0xff]  ;;  %360 = vst [vmem:[%s2038_s7 + $0x108] sm:$0xff] %v359_v33 }
  0x23   : > { %362 = vst [vmem:[%s2038_s7 + $0x110] sm:$0xff] %v361_v34  ;;  %364 = vst [vmem:[%s2038_s7 + $0x118] sm:$0xff] %v363_v35  ;;  %v365_v36 = vld [vmem:[%s2030_s6 + $0x240] sm:$0xff]  ;;  %v367_v37 = vld [vmem:[%s2030_s6 + $0x250] sm:$0xff] }
  0x24   : > { %v369_v38 = vld [vmem:[%s2030_s6 + $0x260] sm:$0xff]  ;;  %366 = vst [vmem:[%s2038_s7 + $0x120] sm:$0xff] %v365_v36  ;;  %368 = vst [vmem:[%s2038_s7 + $0x128] sm:$0xff] %v367_v37  ;;  %v371_v39 = vld [vmem:[%s2030_s6 + $0x270] sm:$0xff] }
  0x25   : > { %370 = vst [vmem:[%s2038_s7 + $0x130] sm:$0xff] %v369_v38  ;;  %372 = vst [vmem:[%s2038_s7 + $0x138] sm:$0xff] %v371_v39 }
  0x26 PF: > { %p1598_p5 = scmp.ge.s32.totalorder %s1959_s20, 1  ;;  %p396_p6 = scmp.lt.s32.totalorder %s1959_s20, 3 }
  0x28   : > { %p397_p7 = pnand %p1598_p5, %p396_p6 }
  0x29   : > { %s403_s8 = sand.u32 (!%p397_p7), 1, %s1951_s18   ;;  %s1599_s9 = sshll.u32 (!%p397_p7), %s2010_s21, 1 }
  0x2a   : > { %400 = sbr.rel (%p397_p7) target bundleno = 775 (0x307), region = 74  ;;  %p438_p8 = scmp.lt.s32.totalorder (!%p397_p7), %s1599_s9, 3 }
  0x2b   : > { %s1735_s10 = smul.u32 (!%p397_p7), 320, %s403_s8  ;;  %s1601_s11 = sshll.u32 (!%p397_p7), %s2010_s21, 5 }
  0x2c   : > { %p444_p9 = scmp.lt.s32.totalorder (!%p397_p7), %s1601_s11, 63  ;;  %p1603_p10 = scmp.ne.s32.totalorder (!%p397_p7), %s2010_s21, 0 }
  0x2d   : > { %s2129_s18 = scalar_lea.vmem (!%p397_p7), [#allocation3], %s1735_s10 }
  0x31   : > { %s2352_s9 = smov (!%p438_p8, %s1599_s9), 3  ;;  %s2354_s11 = smov (!%p444_p9, %s1601_s11), 63 }
  0x32   : > { %s1600_s12 = sshll.u32 %s2352_s9, 1  ;;  %s1736_s16 = smul.u32 12, %s2354_s11  ;;  %v455_v40 = vld [vmem:[%s2342_s0] sm:$0xff] (!%p1603_p10)  ;;  %v456_v41 = vld [vmem:[%s2342_s0 + $0x8] sm:$0xff] (!%p1603_p10)  ;;  %v457_v42 = vld [vmem:[%s2342_s0 + $0x10] sm:$0xff] (!%p1603_p10)  ;;  %vm472_vm0 = vcmask (!%p1603_p10), 519168  }
  0x33   : > { %s2122_s15 = scalar_lea.vmem %s2344_s2, %s1600_s12  ;;  %454 = sbr.rel (%p1603_p10) target bundleno = 58 (0x3a), region = 82  ;;  %v1706_v43 = vpack.c.bf16 (!%p1603_p10), %v456_v41, %v455_v40  ;;  %v1707_v44 = vpack.c.bf16 (!%p1603_p10), %v457_v42, %v457_v42 }
  0x34   : > { %s2127_s23 = scalar_lea.vmem %s2345_s3, %s1736_s16 }
  0x35   : > { %471 = vst [vmem:[#allocation2] sm:$0xff] (!%p1603_p10), %v1706_v43  ;;  %473 = vst.msk [vmem:[#allocation2 + $0x8] sm:$0xf] (!%p1603_p10), %vm472_vm0, %v1707_v44 }
  0x3a PF: > { %v1770_v45 = vld [vmem:[%s2129_s18 + $0x4] ss:$8 sps:$4 sm:$0xff]   ;;  %v1772_v46 = vld [vmem:[%s2129_s18] ss:$8 sps:$4 sm:$0xff]   ;;  %v1773_v47 = vld [vmem:[%s2129_s18 + $0x14] ss:$8 sps:$4 sm:$0xff]  }
  0x3b   : > { %730 = vmatprep.subr.bf16.mxu0 %v1770_v45  ;;  %v1775_v48 = vld [vmem:[%s2129_s18 + $0x10] ss:$8 sps:$4 sm:$0xff]   ;;  %v1776_v49 = vld [vmem:[%s2129_s18 + $0x24] ss:$8 sps:$4 sm:$0xff]   ;;  %v1778_v50 = vld [vmem:[%s2129_s18 + $0x20] ss:$8 sps:$4 sm:$0xff]  }
  0x3c   : > { %731 = vmatpush1.bf16.msra.mxu0 %v1772_v46  ;;  %v1779_v51 = vld [vmem:[%s2129_s18 + $0x34] ss:$8 sps:$4 sm:$0xff]   ;;  %v1781_v52 = vld [vmem:[%s2129_s18 + $0x30] ss:$8 sps:$4 sm:$0xff]   ;;  %v1782_v53 = vld [vmem:[%s2129_s18 + $0x44] ss:$8 sps:$4 sm:$0xff]  }
  0x3d   : > { %732 = vmatprep.subr.bf16.mxu0 %v1773_v47  ;;  %v1784_v54 = vld [vmem:[%s2129_s18 + $0x40] ss:$8 sps:$4 sm:$0xff]   ;;  %v1785_v55 = vld [vmem:[%s2129_s18 + $0x54] ss:$8 sps:$4 sm:$0xff]   ;;  %v1787_v56 = vld [vmem:[%s2129_s18 + $0x50] ss:$8 sps:$4 sm:$0xff]  }
  0x3e   : > { %v1788_v57 = vld [vmem:[%s2129_s18 + $0x64] ss:$8 sps:$4 sm:$0xff]   ;;  %v474_v58 = vld [vmem:[#allocation2] sm:$0xff]  ;;  %v1790_v60 = vld [vmem:[%s2129_s18 + $0x60] ss:$8 sps:$4 sm:$0xff]   ;;  %v1961_v20 = vmov 0  }
  0x3f   : > { %v1607_v59 = vcombine.high %v474_v58, %v474_v58  ;;  %v1791_v61 = vld [vmem:[%s2129_s18 + $0x74] ss:$8 sps:$4 sm:$0xff]   ;;  %v1793_v62 = vld [vmem:[%s2129_s18 + $0x70] ss:$8 sps:$4 sm:$0xff]   ;;  %v1794_v63 = vld [vmem:[%s2129_s18 + $0x84] ss:$8 sps:$4 sm:$0xff]   ;;  %v1606_v16 = vcombine.low %v474_v58, %v474_v58 }
  0x40   : > { %733 = vmatpush1.bf16.msra.mxu0 %v1775_v48  ;;  %v1796_v0 = vld [vmem:[%s2129_s18 + $0x80] ss:$8 sps:$4 sm:$0xff]   ;;  %v1797_v1 = vld [vmem:[%s2129_s18 + $0x94] ss:$8 sps:$4 sm:$0xff]   ;;  %v1799_v2 = vld [vmem:[%s2129_s18 + $0x90] ss:$8 sps:$4 sm:$0xff]  }
  0x41   : > { %734 = vmatprep.subr.bf16.mxu0 %v1776_v49  ;;  %762 = vmatprep.mubr.bf16.mxu0 %v1607_v59  ;;  %v1800_v3 = vld [vmem:[%s2129_s18 + $0xa4] ss:$8 sps:$4 sm:$0xff]   ;;  %v1802_v4 = vld [vmem:[%s2129_s18 + $0xa0] ss:$8 sps:$4 sm:$0xff]   ;;  %v1803_v5 = vld [vmem:[%s2129_s18 + $0xb4] ss:$8 sps:$4 sm:$0xff]   ;;  %v812_v59 = vlaneseq }
  0x42   : > { %v1805_v6 = vld [vmem:[%s2129_s18 + $0xb0] ss:$8 sps:$4 sm:$0xff]   ;;  %v1806_v7 = vld [vmem:[%s2129_s18 + $0xc4] ss:$8 sps:$4 sm:$0xff]   ;;  %v1808_v8 = vld [vmem:[%s2129_s18 + $0xc0] ss:$8 sps:$4 sm:$0xff]  }
  0x43   : > { %v1809_v9 = vld [vmem:[%s2129_s18 + $0xd4] ss:$8 sps:$4 sm:$0xff]   ;;  %v1811_v10 = vld [vmem:[%s2129_s18 + $0xd0] ss:$8 sps:$4 sm:$0xff]   ;;  %v1812_v11 = vld [vmem:[%s2129_s18 + $0xe4] ss:$8 sps:$4 sm:$0xff]  }
  0x44   : > { %735 = vmatpush1.bf16.msra.mxu0 %v1778_v50  ;;  %v1814_v12 = vld [vmem:[%s2129_s18 + $0xe0] ss:$8 sps:$4 sm:$0xff]   ;;  %v1815_v13 = vld [vmem:[%s2129_s18 + $0xf4] ss:$8 sps:$4 sm:$0xff]   ;;  %v1817_v14 = vld [vmem:[%s2129_s18 + $0xf0] ss:$8 sps:$4 sm:$0xff]  }
  0x45   : > { %736 = vmatprep.subr.bf16.mxu0 %v1779_v51  ;;  %v1822_v15 = vld [vmem:[%s2129_s18 + $0x104] ss:$8 sps:$4 sm:$0xff]   ;;  %v1820_v17 = vld [vmem:[%s2129_s18 + $0x100] ss:$8 sps:$4 sm:$0xff]   ;;  %v1825_v18 = vld [vmem:[%s2129_s18 + $0x114] ss:$8 sps:$4 sm:$0xff]  }
  0x46   : > { %v1823_v19 = vld [vmem:[%s2129_s18 + $0x110] ss:$8 sps:$4 sm:$0xff]   ;;  %v1828_v21 = vld [vmem:[%s2129_s18 + $0x124] ss:$8 sps:$4 sm:$0xff]   ;;  %v1826_v22 = vld [vmem:[%s2129_s18 + $0x120] ss:$8 sps:$4 sm:$0xff]  }
  0x47   : > { %v1831_v23 = vld [vmem:[%s2129_s18 + $0x134] ss:$8 sps:$4 sm:$0xff]   ;;  %v1829_v24 = vld [vmem:[%s2129_s18 + $0x130] ss:$8 sps:$4 sm:$0xff]   ;;  %vm726_vm1 = vcmask 523264  }
  0x48   : > { %737 = vmatpush1.bf16.msra.mxu0 %v1781_v52  ;;  %v1832_v25 = vld [vmem:[#allocation2 + $0x8] ss:$0 sps:$4 sm:$0xff]   ;;  %v1833_v26 = vld [vmem:[%s2127_s23 + $0x4] ss:$12 sps:$4 sm:$0xff]   ;;  %v1835_v27 = vld [vmem:[%s2127_s23] ss:$12 sps:$4 sm:$0xff]  }
  0x49   : > { %738 = vmatprep.subr.bf16.mxu0 %v1782_v53  ;;  %1258 = vmatprep.subr.bf16.mxu1 %v1833_v26  ;;  %v1836_v28 = vld [vmem:[%s2127_s23 + $0x1c] ss:$12 sps:$4 sm:$0xff]   ;;  %v1838_v29 = vld [vmem:[%s2127_s23 + $0x18] ss:$12 sps:$4 sm:$0xff]   ;;  %v1839_v30 = vld [vmem:[%s2127_s23 + $0x34] ss:$12 sps:$4 sm:$0xff]  }
  0x4a   : > { %1259 = vmatpush1.bf16.msra.mxu1 %v1835_v27  ;;  %v1841_v31 = vld [vmem:[%s2127_s23 + $0x30] ss:$12 sps:$4 sm:$0xff]   ;;  %v1842_v32 = vld [vmem:[%s2127_s23 + $0x4c] ss:$12 sps:$4 sm:$0xff]   ;;  %v1844_v33 = vld [vmem:[%s2127_s23 + $0x48] ss:$12 sps:$4 sm:$0xff]  }
  0x4b   : > { %1260 = vmatprep.subr.bf16.mxu1 %v1836_v28  ;;  %v1845_v34 = vld [vmem:[%s2127_s23 + $0x64] ss:$12 sps:$4 sm:$0xff]   ;;  %v1847_v35 = vld [vmem:[%s2127_s23 + $0x60] ss:$12 sps:$4 sm:$0xff]   ;;  %v1848_v36 = vld [vmem:[%s2127_s23 + $0x7c] ss:$12 sps:$4 sm:$0xff]  }
  0x4c   : > { %739 = vmatpush1.bf16.msra.mxu0 %v1784_v54  ;;  %v1850_v37 = vld [vmem:[%s2127_s23 + $0x78] ss:$12 sps:$4 sm:$0xff]   ;;  %v1851_v38 = vld [vmem:[%s2127_s23 + $0x94] ss:$12 sps:$4 sm:$0xff]   ;;  %v1853_v39 = vld [vmem:[%s2127_s23 + $0x90] ss:$12 sps:$4 sm:$0xff]  }
  0x4d   : > { %740 = vmatprep.subr.bf16.mxu0 %v1785_v55  ;;  %v1854_v40 = vld [vmem:[%s2127_s23 + $0xac] ss:$12 sps:$4 sm:$0xff]   ;;  %v1856_v41 = vld [vmem:[%s2127_s23 + $0xa8] ss:$12 sps:$4 sm:$0xff]   ;;  %v1857_v42 = vld [vmem:[%s2127_s23 + $0xc4] ss:$12 sps:$4 sm:$0xff]  }
  0x4e   : > { %1261 = vmatpush1.bf16.msra.mxu1 %v1838_v29  ;;  %v1859_v43 = vld [vmem:[%s2127_s23 + $0xc0] ss:$12 sps:$4 sm:$0xff]   ;;  %v1860_v44 = vld [vmem:[%s2127_s23 + $0xdc] ss:$12 sps:$4 sm:$0xff]   ;;  %v1862_v45 = vld [vmem:[%s2127_s23 + $0xd8] ss:$12 sps:$4 sm:$0xff]  }
  0x4f   : > { %1262 = vmatprep.subr.bf16.mxu1 %v1839_v30  ;;  %v1863_v46 = vld [vmem:[%s2127_s23 + $0xf4] ss:$12 sps:$4 sm:$0xff]   ;;  %v1865_v47 = vld [vmem:[%s2127_s23 + $0xf0] ss:$12 sps:$4 sm:$0xff]   ;;  %v1866_v48 = vld [vmem:[%s2127_s23 + $0x10c] ss:$12 sps:$4 sm:$0xff]  }
  0x50   : > { %741 = vmatpush1.bf16.msra.mxu0 %v1787_v56  ;;  %v1868_v49 = vld [vmem:[%s2127_s23 + $0x108] ss:$12 sps:$4 sm:$0xff]   ;;  %v1869_v50 = vld [vmem:[%s2127_s23 + $0x124] ss:$12 sps:$4 sm:$0xff]   ;;  %v1871_v51 = vld [vmem:[%s2127_s23 + $0x120] ss:$12 sps:$4 sm:$0xff]  }
  0x51   : > { %742 = vmatprep.subr.bf16.mxu0 %v1788_v57  ;;  %v1872_v52 = vld [vmem:[%s2127_s23 + $0x13c] ss:$12 sps:$4 sm:$0xff]   ;;  %v1874_v53 = vld [vmem:[%s2127_s23 + $0x138] ss:$12 sps:$4 sm:$0xff]   ;;  %v1875_v54 = vld [vmem:[%s2127_s23 + $0x154] ss:$12 sps:$4 sm:$0xff]  }
  0x52   : > { %1263 = vmatpush1.bf16.msra.mxu1 %v1841_v31  ;;  %v1877_v55 = vld [vmem:[%s2127_s23 + $0x150] ss:$12 sps:$4 sm:$0xff]   ;;  %v1878_v56 = vld [vmem:[%s2127_s23 + $0x16c] ss:$12 sps:$4 sm:$0xff]   ;;  %v1880_v57 = vld [vmem:[%s2127_s23 + $0x168] ss:$12 sps:$4 sm:$0xff]  }
  0x53   : > { %1264 = vmatprep.subr.bf16.mxu1 %v1842_v32  ;;  %v1881_v58 = vld [vmem:[%s2127_s23 + $0xc8] ss:$12 sps:$4 sm:$0xff]  }
  0x54   : > { %743 = vmatpush1.bf16.msra.mxu0 %v1790_v60  ;;  %v2217_v60 = vshrl.u32 %v812_v59, 7 }
  0x55   : > { %744 = vmatprep.subr.bf16.mxu0 %v1791_v61 }
  0x56   : > { %1265 = vmatpush1.bf16.msra.mxu1 %v1844_v33  ;;  %v2220_v61 = vsub.s32 0, %v2217_v60 }
  0x57   : > { %1266 = vmatprep.subr.bf16.mxu1 %v1845_v34 }
  0x58   : > { %745 = vmatpush1.bf16.msra.mxu0 %v1793_v62 }
  0x59   : > { %746 = vmatprep.subr.bf16.mxu0 %v1794_v63 }
  0x5a   : > { %1267 = vmatpush1.bf16.msra.mxu1 %v1847_v35 }
  0x5b   : > { %1268 = vmatprep.subr.bf16.mxu1 %v1848_v36 }
  0x5c   : > { %747 = vmatpush1.bf16.msra.mxu0 %v1796_v0 }
  0x5d   : > { %748 = vmatprep.subr.bf16.mxu0 %v1797_v1 }
  0x5e   : > { %1269 = vmatpush1.bf16.msra.mxu1 %v1850_v37 }
  0x5f   : > { %1270 = vmatprep.subr.bf16.mxu1 %v1851_v38 }
  0x60   : > { %749 = vmatpush1.bf16.msra.mxu0 %v1799_v2 }
  0x61   : > { %750 = vmatprep.subr.bf16.mxu0 %v1800_v3 }
  0x62   : > { %1271 = vmatpush1.bf16.msra.mxu1 %v1853_v39 }
  0x63   : > { %1272 = vmatprep.subr.bf16.mxu1 %v1854_v40 }
  0x64   : > { %751 = vmatpush1.bf16.msra.mxu0 %v1802_v4 }
  0x65   : > { %752 = vmatprep.subr.bf16.mxu0 %v1803_v5 }
  0x66   : > { %1273 = vmatpush1.bf16.msra.mxu1 %v1856_v41 }
  0x67   : > { %1274 = vmatprep.subr.bf16.mxu1 %v1857_v42 }
  0x68   : > { %753 = vmatpush1.bf16.msra.mxu0 %v1805_v6 }
  0x69   : > { %754 = vmatprep.subr.bf16.mxu0 %v1806_v7 }
  0x6a   : > { %1275 = vmatpush1.bf16.msra.mxu1 %v1859_v43 }
  0x6b   : > { %1276 = vmatprep.subr.bf16.mxu1 %v1860_v44  ;;  %v1962_v44 = vmov 1983009808  }
  0x6c   : > { %755 = vmatpush1.bf16.msra.mxu0 %v1808_v8 }
  0x6d   : > { %756 = vmatprep.subr.bf16.mxu0 %v1809_v9 }
  0x6e   : > { %1277 = vmatpush1.bf16.msra.mxu1 %v1862_v45  ;;  %v869_v45 = vunpack.c.l.s4 %v1962_v44 }
  0x6f   : > { %1278 = vmatprep.subr.bf16.mxu1 %v1863_v46 }
  0x70   : > { %757 = vmatpush1.bf16.msra.mxu0 %v1811_v10  ;;  %v870_v46 = vunpack.c.0.s8 %v869_v45 }
  0x71   : > { %758 = vmatprep.subr.bf16.mxu0 %v1812_v11 }
  0x72   : > { %1279 = vmatpush1.bf16.msra.mxu1 %v1865_v47 }
  0x73   : > { %1280 = vmatprep.subr.bf16.mxu1 %v1866_v48  ;;  %v2233_v48 = vsub.s32 %v870_v46, %v2217_v60 }
  0x74   : > { %759 = vmatpush1.bf16.msra.mxu0 %v1814_v12 }
  0x75   : > { %760 = vmatprep.subr.bf16.mxu0 %v1815_v13 }
  0x76   : > { %1281 = vmatpush1.bf16.msra.mxu1 %v1868_v49 }
  0x77   : > { %1282 = vmatprep.subr.bf16.mxu1 %v1869_v50 }
  0x78   : > { %761 = vmatpush1.bf16.msra.mxu0 %v1817_v14 }
  0x79   : > { %771 = vmatprep.subr.bf16.mxu0 %v1822_v15 }
  0x7a   : > { %1283 = vmatpush1.bf16.msra.mxu1 %v1871_v51  ;;  %v860_v51 = vld [vmem:[%s2122_s15] sm:$0xf] }
  0x7b   : > { %763 = vmatmul.mubr.bf16.vlgmr.msra.gmra.mrb[0].mxu0 %v1606_v16  ;;  %1284 = vmatprep.subr.bf16.mxu1 %v1872_v52 }
  0x7c   : > { %772 = vmatpush1.bf16.msra.mxu0 %v1820_v17  ;;  %803 = vmatprep.mubr.bf16.mxu0 %v1961_v20 }
  0x7d   : > { %773 = vmatprep.subr.bf16.mxu0 %v1825_v18 }
  0x7e   : > { %1285 = vmatpush1.bf16.msra.mxu1 %v1874_v53  ;;  %v884_v53 = vsub.s32 2, %v2217_v60 }
  0x7f   : > { %1286 = vmatprep.subr.bf16.mxu1 %v1875_v54 }
  0x80   : > { %774 = vmatpush1.bf16.msra.mxu0 %v1823_v19 }
  0x81   : > { %775 = vmatprep.subr.bf16.mxu0 %v1828_v21 }
  0x82   : > { %1287 = vmatpush1.bf16.msra.mxu1 %v1877_v55 }
  0x83   : > { %1288 = vmatprep.subr.bf16.mxu1 %v1878_v56 }
  0x84   : > { %776 = vmatpush1.bf16.msra.mxu0 %v1826_v22 }
  0x85   : > { %777 = vmatprep.subr.bf16.mxu0 %v1831_v23 }
  0x86   : > { %1289 = vmatpush1.bf16.msra.mxu1 %v1880_v57 }
  0x87   : > { %1708 = vmatprep.subr.bf16.mxu1 %v1881_v58 }
  0x88   : > { %778 = vmatpush1.bf16.msra.mxu0 %v1829_v24 }
  0x8b   : > { %1649 = vmatmul.mubr.msk.bf16.vlgmr.msra.gmra.mrb[0].mxu0 %vm726_vm1, %v1832_v25 }
 0x15e   : > { %v2222_v62 = vpop.f32.mrb[0].mxu0 }
 0x15f   : > { %v815_v63 = vrot.slane %v2222_v62, %v2220_v61  ;;  %v2226_v0 = vpop.f32.mrb[1].mxu0 }
 0x160   : > { %v819_v1 = vrot.slane %v2226_v0, %v2220_v61  ;;  %v809_v2 = vpop.f32.mrb[2].mxu0 }
 0x161   : > { %v820_v3 = vsub.f32 %v2222_v62, %v815_v63  ;;  %v810_v4 = vpop.f32.mrb[3].mxu0 }
 0x162   : > { %v821_v5 = vsub.f32 %v2226_v0, %v819_v1 }
 0x163   : > { %v822_v6 = vrot.slane %v820_v3, 4  ;;  %v836_v7 = vmul.f32 %v820_v3, %v820_v3 }
 0x164   : > { %v828_v8 = vrot.slane %v821_v5, 4  ;;  %v837_v9 = vmul.f32 %v821_v5, %v821_v5 }
 0x165   : > { %v823_v10 = vadd.f32 %v822_v6, %v820_v3  ;;  %v838_v11 = vrot.slane %v836_v7, 4 }
 0x166   : > { %v829_v12 = vadd.f32 %v828_v8, %v821_v5  ;;  %v844_v13 = vrot.slane %v837_v9, 4  ;;  %v2249_v8 = vsub.s32 1, %v2217_v60 }
 0x167   : > { %v824_v14 = vrot.slane %v823_v10, 2  ;;  %v839_v15 = vadd.f32 %v838_v11, %v836_v7 }
 0x168   : > { %v830_v16 = vrot.slane %v829_v12, 2  ;;  %v845_v17 = vadd.f32 %v844_v13, %v837_v9  ;;  %v920_v9 = vsub.s32 3, %v2217_v60 }
 0x169   : > { %v825_v18 = vadd.f32 %v824_v14, %v823_v10  ;;  %v840_v19 = vrot.slane %v839_v15, 2 }
 0x16a   : > { %v831_v20 = vadd.f32 %v830_v16, %v829_v12  ;;  %v846_v21 = vrot.slane %v845_v17, 2 }
 0x16b   : > { %v826_v22 = vrot.slane %v825_v18, 1  ;;  %v841_v23 = vadd.f32 %v840_v19, %v839_v15  ;;  %v1882_v19 = vld [vmem:[%s2127_s23 + $0x8] ss:$12 sps:$4 sm:$0xff]  }
 0x16c   : > { %v832_v24 = vrot.slane %v831_v20, 1  ;;  %v847_v25 = vadd.f32 %v846_v21, %v845_v17  ;;  %v1884_v21 = vld [vmem:[%s2127_s23 + $0x20] ss:$12 sps:$4 sm:$0xff]  }
 0x16d   : > { %v827_v26 = vadd.f32 %v826_v22, %v825_v18  ;;  %v842_v27 = vrot.slane %v841_v23, 1  ;;  %v1885_v22 = vld [vmem:[%s2127_s23 + $0xf8] ss:$12 sps:$4 sm:$0xff]  }
 0x16e   : > { %v833_v28 = vadd.f32 %v832_v24, %v831_v20  ;;  %v848_v29 = vrot.slane %v847_v25, 1  ;;  %v1883_v20 = vld [vmem:[%s2127_s23 + $0xe0] ss:$12 sps:$4 sm:$0xff]   ;;  %v1887_v24 = vld [vmem:[%s2127_s23 + $0x110] ss:$12 sps:$4 sm:$0xff]  }
 0x16f   : > { %v834_v30 = vmul.f32 0.125, %v827_v26  ;;  %v843_v31 = vadd.f32 %v842_v27, %v841_v23  ;;  %v1886_v23 = vld [vmem:[%s2127_s23 + $0x38] ss:$12 sps:$4 sm:$0xff]   ;;  %v1889_v26 = vld [vmem:[%s2127_s23 + $0x128] ss:$12 sps:$4 sm:$0xff]  }
 0x170   : > { %v835_v32 = vmul.f32 0.125, %v833_v28  ;;  %v849_v33 = vadd.f32 %v848_v29, %v847_v25  ;;  %v1888_v25 = vld [vmem:[%s2127_s23 + $0x50] ss:$12 sps:$4 sm:$0xff]   ;;  %v1890_v27 = vld [vmem:[%s2127_s23 + $0x68] ss:$12 sps:$4 sm:$0xff]  }
 0x171   : > { %v850_v34 = vmul.f32 0.125, %v843_v31  ;;  %v852_v35 = vmul.f32 %v834_v30, %v834_v30  ;;  %v858_v55 = vadd.f32 %v834_v30, %v2222_v62  ;;  %v1891_v28 = vld [vmem:[%s2127_s23 + $0x140] ss:$12 sps:$4 sm:$0xff]   ;;  %v1893_v30 = vld [vmem:[%s2127_s23 + $0x158] ss:$12 sps:$4 sm:$0xff]  }
 0x172   : > { %v851_v36 = vmul.f32 0.125, %v849_v33  ;;  %v853_v37 = vmul.f32 %v835_v32, %v835_v32  ;;  %v859_v56 = vadd.f32 %v835_v32, %v2226_v0  ;;  %v1892_v29 = vld [vmem:[%s2127_s23 + $0x80] ss:$12 sps:$4 sm:$0xff]   ;;  %v1894_v31 = vld [vmem:[%s2127_s23 + $0x98] ss:$12 sps:$4 sm:$0xff]  }
 0x173   : > { %v854_v38 = vsub.f32 %v850_v34, %v852_v35  ;;  %v1895_v32 = vld [vmem:[%s2127_s23 + $0x170] ss:$12 sps:$4 sm:$0xff]  }
 0x174   : > { %v855_v39 = vsub.f32 %v851_v36, %v853_v37  ;;  %v1896_v33 = vld [vmem:[%s2127_s23 + $0xb0] ss:$12 sps:$4 sm:$0xff]  }
 0x175   : > { %v856_v40 = vmax.f32 %v854_v38, 0.0 }
 0x176   : > { %v857_v41 = vmax.f32 %v855_v39, 0.0 }
 0x177   : > { %v861_v42 = vadd.f32 1e-05, %v856_v40 }
 0x178   : > { %v862_v43 = vadd.f32 1e-05, %v857_v41 }
 0x179   : > { %1897 = vrsqrt.f32 %v861_v42 }
 0x17a   : > { %1899 = vrsqrt.f32 %v862_v43 }
 0x183   : > { %v1898_v47 = vpop.eup %1897 }
 0x184   : > { %v1900_v49 = vpop.eup %1899 }
 0x185   : > { %v867_v50 = vcombine.low %v1898_v47, %v1900_v49 }
 0x187   : > { %v874_v52 = vrot.slane %v867_v50, %v2233_v48 }
 0x189   : > { %v876_v54 = vmul.f32 %v874_v52, %v860_v51 }
 0x18b   : > { %v881_v57 = vrot.slane %v876_v54, %v2220_v61  ;;  %v885_v58 = vrot.slane %v876_v54, %v884_v53 }
 0x18d   : > { %v888_v59 = vmul.f32 %v881_v57, %v858_v55  ;;  %v889_v63 = vmul.f32 %v885_v58, %v859_v56  ;;  %v910_v1 = vrot.slane %v885_v58, %v2220_v61  ;;  %v906_v2 = vrot.slane %v881_v57, %v2220_v61 }
 0x18f   : > { %v892_v3 = vcombine.low %v888_v59, %v889_v63  ;;  %v912_v4 = vmul.f32 %v910_v1, %v2226_v0  ;;  %v911_v5 = vmul.f32 %v906_v2, %v2222_v62 }
 0x191   : > { %v899_v6 = vrot.slane %v892_v3, %v2233_v48 }
 0x193   : > { %v900_v7 = vrot.slane %v899_v6, 7 }
 0x195   : > { %v902_v10 = vsub.f32 %v860_v51, %v900_v7 }
 0x197   : > { %v921_v11 = vrot.slane %v902_v10, %v920_v9  ;;  %v917_v12 = vrot.slane %v902_v10, %v2249_v8 }
 0x199   : > { %v931_v0 = vrot.slane %v921_v11, %v2249_v8  ;;  %v927_v62 = vrot.slane %v917_v12, %v2249_v8 }
 0x19b   : > { %v933_v13 = vadd.f32 %v931_v0, %v912_v4  ;;  %v932_v14 = vadd.f32 %v927_v62, %v911_v5 }
 0x19d   : > { %v935_v15 = vmax.f32 %v933_v13, 0.0  ;;  %v934_v16 = vmax.f32 %v932_v14, 0.0 }
 0x19f   : > { %v937_v17 = vpack.c.bf16 %v935_v15, %v935_v15  ;;  %v936_v18 = vpack.c.bf16 %v934_v16, %v934_v16 }
 0x1a1   : > { %1290 = vmatprep.mubr.bf16.mxu1 %v937_v17 }
 0x1a2   : > { %1291 = vmatmul.mubr.bf16.vlgmr.msra.gmra.mrb[0].mxu1 %v936_v18 }
 0x1a3   : > { %1709 = vmatpush3.bf16.msra.mxu1 %v1882_v19  ;;  %1331 = vmatprep.mubr.bf16.mxu1 %v937_v17 }
 0x1a4   : > { %1710 = vmatprep.subr.bf16.mxu1 %v1883_v20 }
 0x1a7   : > { %1711 = vmatpush3.bf16.msra.mxu1 %v1884_v21 }
 0x1a8   : > { %1712 = vmatprep.subr.bf16.mxu1 %v1885_v22 }
 0x1ab   : > { %1713 = vmatpush3.bf16.msra.mxu1 %v1886_v23 }
 0x1ac   : > { %1714 = vmatprep.subr.bf16.mxu1 %v1887_v24 }
 0x1af   : > { %1715 = vmatpush3.bf16.msra.mxu1 %v1888_v25 }
 0x1b0   : > { %1716 = vmatprep.subr.bf16.mxu1 %v1889_v26 }
 0x1b3   : > { %1717 = vmatpush3.bf16.msra.mxu1 %v1890_v27 }
 0x1b4   : > { %1718 = vmatprep.subr.bf16.mxu1 %v1891_v28 }
 0x1b7   : > { %1719 = vmatpush3.bf16.msra.mxu1 %v1892_v29 }
 0x1b8   : > { %1720 = vmatprep.subr.bf16.mxu1 %v1893_v30 }
 0x1bb   : > { %1721 = vmatpush3.bf16.msra.mxu1 %v1894_v31 }
 0x1bc   : > { %1722 = vmatprep.subr.bf16.mxu1 %v1895_v32 }
 0x1bf   : > { %1723 = vmatpush3.bf16.msra.mxu1 %v1896_v33 }
 0x1c2   : > { %1332 = vmatmul.mubr.bf16.vlgmr.msra.gmra.mrb[4].mxu1 %v936_v18 }
 0x275   : > { %v1292_v34 = vpop.f32.mrb[0].mxu1 }
 0x276   : > { %v1294_v35 = vpop.f32.mrb[1].mxu1  ;;  %1342 = vst [vmem:[#allocation4] sm:$0xff] (!%p1603_p10), %v1292_v34 }
 0x277   : > { %v1296_v36 = vpop.f32.mrb[2].mxu1  ;;  %1343 = vst [vmem:[#allocation4 + $0x8] sm:$0xff] (!%p1603_p10), %v1294_v35 }
 0x278   : > { %v1297_v37 = vpop.f32.mrb[3].mxu1 }
 0x292   : > { %1341 = sbr.rel (%p1603_p10) target bundleno = 666 (0x29a), region = 86 }
 0x295   : > { %v1724_v38 = vpop.f32.mrb[4].mxu1 }
 0x296   : > { %v1725_v39 = vpop.f32.mrb[5].mxu1 }
 0x297   : > { %v1726_v40 = vadd.f32 %v1725_v39, %v1724_v38  ;;  %v1727_v41 = vpop.f32.mrb[6].mxu1 }
 0x298   : > { %v1728_v42 = vpop.f32.mrb[7].mxu1 }
 0x299   : > { %1344 = vst.msk [vmem:[#allocation4 + $0x10] sm:$0xff] %vm726_vm1, %v1726_v40 }
 0x29a PF: > { %p1699_p11 = scmp.le.s32.totalorder %s2010_s21, 0 }
 0x29b   : > { %v1349_v43 = vld [vmem:[#allocation4] sm:$0xff] (!%p1699_p11)  ;;  %v1350_v44 = vld [vmem:[#allocation4 + $0x8] sm:$0xff] (!%p1699_p11) }
 0x29c   : > { %1348 = sbr.rel (%p1699_p11) target bundleno = 676 (0x2a4), region = 90  ;;  %v1352_v46 = vadd.f32 (!%p1699_p11), %v1349_v43, %v1292_v34  ;;  %v1353_v47 = vadd.f32 (!%p1699_p11), %v1350_v44, %v1294_v35 }
 0x29e   : > { %1355 = vst [vmem:[#allocation4] sm:$0xff] (!%p1699_p11), %v1352_v46  ;;  %1356 = vst [vmem:[#allocation4 + $0x8] sm:$0xff] (!%p1699_p11), %v1353_v47 }
 0x2a0   : > { %v1351_v45 = vld [vmem:[#allocation4 + $0x10] sm:$0xff] (!%p1699_p11) }
 0x2a1   : > { %v1354_v49 = vadd.f32 (!%p1699_p11), %v1726_v40, %v1351_v45 }
 0x2a3   : > { %1357 = vst.msk [vmem:[#allocation4 + $0x10] sm:$0xff] %vm726_vm1, %v1354_v49 }
 0x2a4 PF: > { %p1700_p12 = scmp.ne.s32.totalorder %s2010_s21, 1 }
 0x2a6   : > { %1361 = sbr.rel (%p1700_p12) target bundleno = 750 (0x2ee), region = 94  ;;  %v1362_v50 = vld [vmem:[#allocation4] sm:$0xff] (!%p1700_p12)  ;;  %v1363_v51 = vld [vmem:[#allocation4 + $0x8] sm:$0xff] (!%p1700_p12) }
 0x2a7   : > { %v1365_v54 = vrot.slane (!%p1700_p12), %v1362_v50, 4  ;;  %v1371_v55 = vrot.slane (!%p1700_p12), %v1363_v51, 4 }
 0x2a9   : > { %v1366_v58 = vadd.f32 (!%p1700_p12), %v1365_v54, %v1362_v50  ;;  %v1372_v59 = vadd.f32 (!%p1700_p12), %v1371_v55, %v1363_v51  ;;  %v1485_v55 = vsub.s32 (!%p1700_p12), 5, %v2217_v60 }
 0x2aa   : > { %v1364_v52 = vld [vmem:[#allocation4 + $0x10] sm:$0xff] (!%p1700_p12) }
 0x2ab   : > { %v1377_v56 = vsel (!%p1700_p12), %vm726_vm1, %v1364_v52, 0.0  ;;  %v1367_v1 = vrot.slane (!%p1700_p12), %v1366_v58, 2  ;;  %v1373_v2 = vrot.slane (!%p1700_p12), %v1372_v59, 2 }
 0x2ac   : > { %v1378_v57 = vrot.slane (!%p1700_p12), %v1377_v56, 4 }
 0x2ad   : > { %v1368_v4 = vadd.f32 %v1367_v1, %v1366_v58  ;;  %v1374_v5 = vadd.f32 %v1373_v2, %v1372_v59  ;;  %v1454_v58 = vsub.s32 4, %v2217_v60  ;;  %v1505_v60 = vld [vmem:[%s2342_s0] sm:$0xff] }
 0x2ae   : > { %v1379_v63 = vadd.f32 %v1378_v57, %v1377_v56  ;;  %v1415_v56 = vld [vmem:[%s2346_s4] sm:$0x3f] }
 0x2af   : > { %v1369_v7 = vrot.slane %v1368_v4, 1  ;;  %v1375_v10 = vrot.slane %v1374_v5, 1  ;;  %v1478_v59 = vrot.slane %v1415_v56, %v2249_v8  ;;  %v1486_v2 = vrot.slane %v1415_v56, %v1485_v55 }
 0x2b0   : > { %v1380_v3 = vrot.slane %v1379_v63, 2 }
 0x2b1   : > { %v1370_v12 = vadd.f32 %v1369_v7, %v1368_v4  ;;  %v1376_v0 = vadd.f32 %v1375_v10, %v1374_v5  ;;  %v1493_v5 = vrot.slane %v1478_v59, %v2249_v8 }
 0x2b2   : > { %v1381_v6 = vadd.f32 %v1380_v3, %v1379_v63  ;;  %v1482_v63 = vrot.slane %v1415_v56, %v920_v9  ;;  %v1501_v9 = vrot.slane %v1486_v2, %v2249_v8 }
 0x2b3   : > { %v1384_v13 = vmul.f32 0.125, %v1370_v12  ;;  %v1385_v14 = vmul.f32 0.125, %v1376_v0 }
 0x2b4   : > { %v1382_v11 = vrot.slane %v1381_v6, 1 }
 0x2b5   : > { %v1387_v16 = vsub.f32 %v1362_v50, %v1384_v13  ;;  %v1388_v17 = vsub.f32 %v1363_v51, %v1385_v14  ;;  %v1507_v13 = vld [vmem:[%s2342_s0 + $0x10] sm:$0xff] }
 0x2b6   : > { %v1383_v62 = vadd.f32 %v1382_v11, %v1381_v6  ;;  %v1497_v6 = vrot.slane %v1482_v63, %v2249_v8 }
 0x2b7   : > { %v1390_v19 = vmul.f32 %v1387_v16, %v1387_v16  ;;  %v1391_v20 = vmul.f32 %v1388_v17, %v1388_v17 }
 0x2b8   : > { %v1386_v15 = vmul.f32 0.125, %v1383_v62 }
 0x2b9   : > { %v1393_v22 = vrot.slane %v1390_v19, 4  ;;  %v1399_v23 = vrot.slane %v1391_v20, 4 }
 0x2ba   : > { %v1389_v18 = vsub.f32 %v1364_v52, %v1386_v15 }
 0x2bb   : > { %v1394_v25 = vadd.f32 %v1393_v22, %v1390_v19  ;;  %v1400_v26 = vadd.f32 %v1399_v23, %v1391_v20 }
 0x2bc   : > { %v1392_v21 = vmul.f32 %v1389_v18, %v1389_v18 }
 0x2bd   : > { %v1395_v28 = vrot.slane %v1394_v25, 2  ;;  %v1401_v29 = vrot.slane %v1400_v26, 2 }
 0x2be   : > { %v1405_v24 = vsel %vm726_vm1, %v1392_v21, 0.0 }
 0x2bf   : > { %v1406_v27 = vrot.slane %v1405_v24, 4  ;;  %v1396_v31 = vadd.f32 %v1395_v28, %v1394_v25  ;;  %v1402_v32 = vadd.f32 %v1401_v29, %v1400_v26 }
 0x2c1   : > { %v1407_v30 = vadd.f32 %v1406_v27, %v1405_v24  ;;  %v1397_v34 = vrot.slane %v1396_v31, 1  ;;  %v1403_v35 = vrot.slane %v1402_v32, 1 }
 0x2c3   : > { %v1408_v33 = vrot.slane %v1407_v30, 2  ;;  %v1398_v37 = vadd.f32 %v1397_v34, %v1396_v31  ;;  %v1404_v38 = vadd.f32 %v1403_v35, %v1402_v32 }
 0x2c5   : > { %v1409_v36 = vadd.f32 %v1408_v33, %v1407_v30  ;;  %v1412_v41 = vmul.f32 0.125, %v1398_v37  ;;  %v1413_v42 = vmul.f32 0.125, %v1404_v38 }
 0x2c7   : > { %v1410_v39 = vrot.slane %v1409_v36, 1  ;;  %v1416_v44 = vadd.f32 1e-05, %v1412_v41  ;;  %v1417_v45 = vadd.f32 1e-05, %v1413_v42 }
 0x2c9   : > { %v1411_v40 = vadd.f32 %v1410_v39, %v1409_v36  ;;  %1901 = vrsqrt.f32 %v1416_v44 }
 0x2ca   : > { %1903 = vrsqrt.f32 %v1417_v45 }
 0x2cb   : > { %v1414_v43 = vmul.f32 0.125, %v1411_v40 }
 0x2cd   : > { %v1418_v46 = vadd.f32 1e-05, %v1414_v43 }
 0x2cf   : > { %1905 = vrsqrt.f32 %v1418_v46 }
 0x2d3   : > { %v1902_v47 = vpop.eup %1901 }
 0x2d4   : > { %v1904_v49 = vpop.eup %1903 }
 0x2d5   : > { %v1425_v51 = vcombine.low %v1902_v47, %v1904_v49 }
 0x2d7   : > { %v1432_v54 = vrot.slane %v1425_v51, %v2233_v48 }
 0x2d9   : > { %v1906_v50 = vpop.eup %1905 }
 0x2da   : > { %v1439_v52 = vrot.slane %v1906_v50, %v2233_v48 }
 0x2dc   : > { %v1440_v57 = vcombine.low %v1432_v54, %v1439_v52 }
 0x2de   : > { %v1442_v1 = vmul.f32 %v1440_v57, %v1415_v56 }
 0x2e0   : > { %v1447_v3 = vrot.slane %v1442_v1, %v2220_v61  ;;  %v1451_v48 = vrot.slane %v1442_v1, %v884_v53  ;;  %v1455_v4 = vrot.slane %v1442_v1, %v1454_v58  ;;  %v1506_v53 = vld [vmem:[%s2342_s0 + $0x8] sm:$0xff] }
 0x2e2   : > { %v1462_v7 = vrot.slane %v1447_v3, %v2220_v61  ;;  %v1466_v10 = vrot.slane %v1451_v48, %v2220_v61  ;;  %v1470_v11 = vrot.slane %v1455_v4, %v2220_v61 }
 0x2e4   : > { %v1471_v12 = vmul.f32 %v1462_v7, %v1387_v16  ;;  %v1472_v0 = vmul.f32 %v1466_v10, %v1388_v17  ;;  %v1473_v62 = vmul.f32 %v1470_v11, %v1389_v18 }
 0x2e6   : > { %v1502_v14 = vadd.f32 %v1493_v5, %v1471_v12  ;;  %v1503_v15 = vadd.f32 %v1497_v6, %v1472_v0  ;;  %v1504_v61 = vadd.f32 %v1501_v9, %v1473_v62 }
 0x2e8   : > { %v1508_v19 = vadd.f32 %v1505_v60, %v1502_v14  ;;  %v1509_v8 = vadd.f32 %v1506_v53, %v1503_v15  ;;  %v1510_v16 = vadd.f32 %v1507_v13, %v1504_v61 }
 0x2ea   : > { %v1511_v17 = vmax.f32 %v1508_v19, 0.0  ;;  %v1512_v18 = vmax.f32 %v1509_v8, 0.0  ;;  %v1513_v20 = vmax.f32 %v1510_v16, 0.0 }
 0x2ec   : > { %1514 = vst [vmem:[#allocation4] sm:$0xff] %v1511_v17  ;;  %1515 = vst [vmem:[#allocation4 + $0x8] sm:$0xff] %v1512_v18 }
 0x2ed   : > { %1516 = vst.msk [vmem:[#allocation4 + $0x10] sm:$0xff] %vm726_vm1, %v1513_v20 }
 0x2ee PF: > { %p1741_p13 = scmp.eq.s32.totalorder %s2010_s21, 1  ;;  %s1963_s14 = smov [#allocation4]  }
 0x2ef   : > { %s1524_s15 = sshll.u32 %s1963_s14, 4  ;;  %s1525_s15 = int_to_ptr.vmem [resolvable:$true] %s1524_s15 }
 0x2f0   : > { %s1907_s16 = scalar_lea.vmem %s1525_s15, 384  ;;  %p1914_p3 = scmp.lt.s32.totalorder %s1525_s15, %s1525_s15 }
 0x2f1   : > { %p1908_p0 = scmp.ne.s32.totalorder %s1525_s15, %s1907_s16  ;;  %p1915_p4 = scmp.lt.s32.totalorder %s1907_s16, %s1907_s16 }
 0x2f3   : > { %p1909_p1 = pnand %p1908_p0, %p1741_p13  ;;  %p1916_p5 = por %p1915_p4, %p1914_p3 }
 0x2f5   : > { %p1910_p2 = pneg %p1909_p1 }
 0x2f7   : > { %p1917_p6 = pnand %p1916_p5, %p1910_p2 }
 0x2f9   : > { %1920 = shalt.err (!%p1917_p6)
}
 0x2fa   : > { %s1921_s23 = scalar_lea.hbm %s2347_s5, 384 }
 0x2fb   : > { %p1922_p7 = scmp.ne.s32.totalorder %s2347_s5, %s1921_s23  ;;  %p1927_p10 = scmp.lt.u32.totalorder %s1921_s23, %s2347_s5 }
 0x2fd   : > { %p1923_p8 = pnand %p1922_p7, %p1741_p13 }
 0x2ff   : > { %p1924_p9 = pneg %p1923_p8 }
 0x301   : > { %p1929_p11 = pnand %p1927_p10, %p1924_p9 }
 0x303   : > { %1932 = shalt.err (!%p1929_p11)
}
 0x304   : > { %1738 = dma.vmem_to_hbm [thread:$0]  (%p1741_p13), %s1525_s15, 384, %s2347_s5, [#allocation5]  }
 0x305   : > { %1946 = dma.done.wait (%p1741_p13), [#allocation5], 384  }
 0x306   : > { %1948 = vsyncadd (%p1741_p13), [#allocation5], 4294966912 }
 0x307 PF: > { %p13_p12 = scmp.ge.s32.totalorder %s2013_s22, 4   ;;  %s2348_s18 = smov %s1955_s19 }
 0x308   : > { %s2349_s19 = smov %s2022_s25  ;;  %s2350_s20 = smov %s2013_s22 }
 0x309   :  { %15 = sbr.rel (!%p13_p12) target bundleno = 2 (0x2), region = 132 }
 0x310   :  { %1537 = vsyncpa [#allocation5], 1 }
 0x311   :  { %1539 = vsyncpa [#allocation5 + $0x1], 1 }

</bundles_post_ra>
